<compile_context>
chip_gen: v7x
topology: tpu7x:2x2x1
jax: 0.10.0
libtpu: 0.0.40
codegen_flags: <defaults>
</compile_context>

<pallas_src>
import math

import jax
import jax.numpy as jnp
from jax.experimental import pallas as pl
from jax.experimental.pallas import tpu as pltpu

_LANE = 1024            # lane-dense last dim (multiple of 128)
_MAX_BLOCK_ROWS = 512   # (512, 1024) f32 ~= 2 MiB per block


def _make_replace_kernel(nodata_value: float, replace_value: float):
    def kernel(x_ref, o_ref):
        x = x_ref[...]
        # scalar select: one vcmp + one vsel per vreg, no broadcast tile materialized
        o_ref[...] = jnp.where(x == nodata_value,
                               jnp.asarray(replace_value, dtype=x.dtype),
                               x)
    return kernel


def replace_nodata_value(img, mask, nodata_value: float, replace_value: float):
    """Pallas equivalent of ReplaceNoDataValueTransform.forward.

    img:  (N, C, H, W) float array (any shape works; it is flattened internally)
    mask: any array, returned unchanged
    """
    orig_shape = img.shape
    dtype = img.dtype
    total = math.prod(orig_shape)

    # --- flatten to a lane-dense (rows, 1024) slab --------------------------------
    rows_unpadded = -(-total // _LANE)                       # ceil(total / LANE)
    block_rows = min(_MAX_BLOCK_ROWS, rows_unpadded)
    rows = -(-rows_unpadded // block_rows) * block_rows      # pad rows to full blocks
    padded_total = rows * _LANE

    flat = img.reshape(-1)
    if padded_total != total:
        flat = jnp.pad(flat, (0, padded_total - total))
    x2d = flat.reshape(rows, _LANE)

    grid = (rows // block_rows,)

    out2d = pl.pallas_call(
        _make_replace_kernel(nodata_value, replace_value),
        out_shape=jax.ShapeDtypeStruct((rows, _LANE), dtype),
        grid_spec=pl.GridSpec(
            grid=grid,
            in_specs=[pl.BlockSpec((block_rows, _LANE), lambda i: (i, 0))],
            out_specs=pl.BlockSpec((block_rows, _LANE), lambda i: (i, 0)),
        ),
        compiler_params=pltpu.CompilerParams(
            dimension_semantics=("parallel",),
        ),
        # TODO(synk): add input_output_aliases={0: 0} when img is donated at the jit
        # boundary to make the update in-place and halve HBM footprint.
    )(x2d)

    out = out2d.reshape(-1)[:total].reshape(orig_shape)
    return out, mask


if __name__ == "__main__":
    key = jax.random.PRNGKey(0)
    k_img, k_nod, k_mask = jax.random.split(key, 3)

    N, C, H, W = 2, 4, 16, 16
    NODATA = -9999.0
    REPLACE = 0.0

    img = jax.random.normal(k_img, (N, C, H, W), dtype=jnp.float32)
    # Sprinkle some nodata values deterministically.
    nodata_positions = jax.random.bernoulli(k_nod, 0.2, (N, C, H, W))
    img = jnp.where(nodata_positions, jnp.float32(NODATA), img)

    mask = (jax.random.uniform(k_mask, (N, 1, H, W)) > 0.5).astype(jnp.int32)

    out_img, out_mask = replace_nodata_value(img, mask, NODATA, REPLACE)
    out_img = jax.block_until_ready(out_img)
    out_mask = jax.block_until_ready(out_mask)

    # Reference check against plain JAX semantics (img[img == nodata] = replace).
    ref = jnp.where(img == NODATA, jnp.float32(REPLACE), img)
    assert jnp.array_equal(out_img, ref), "mismatch vs reference"
    assert jnp.array_equal(out_mask, mask), "mask should pass through unchanged"
    assert out_img.dtype == img.dtype and out_img.shape == img.shape

    print("KERNEL_OK")
</pallas_src>

<mosaic_0001>
module attributes {stable_mosaic.version = 11 : i64} {
  func.func @kernel(%arg0: i32, %arg1: memref<2x1024xf32, #tpu.memory_space<vmem>>, %arg2: memref<2x1024xf32, #tpu.memory_space<vmem>>) attributes {dimension_semantics = [#tpu.dimension_semantics<parallel>], iteration_bounds = array<i64: 1>, scalar_prefetch = 0 : i64, scratch_operands = 0 : i64, tpu.core_type = #tpu.core_type<tc>, window_params = [{transform_indices = @transform_0, window_bounds = array<i64: 2, 1024>}, {transform_indices = @transform_1, window_bounds = array<i64: 2, 1024>}]} {
    %c0 = arith.constant 0 : index
    %c0_0 = arith.constant 0 : index
    %0 = vector.load %arg1[%c0, %c0_0] : memref<2x1024xf32, #tpu.memory_space<vmem>>, vector<2x1024xf32>
    %cst = arith.constant -9.999000e+03 : f32
    %1 = vector.broadcast %cst : f32 to vector<2x1024xf32>
    %2 = arith.cmpf oeq, %0, %1 : vector<2x1024xf32>
    %cst_1 = arith.constant 0.000000e+00 : f32
    %3 = vector.broadcast %cst_1 : f32 to vector<2x1024xf32>
    %4 = arith.select %2, %3, %0 : vector<2x1024xi1>, vector<2x1024xf32>
    %c0_2 = arith.constant 0 : index
    %c0_3 = arith.constant 0 : index
    %5 = vector.load %arg2[%c0_2, %c0_3] : memref<2x1024xf32, #tpu.memory_space<vmem>>, vector<2x1024xf32>
    tpu.vector_store %arg2[%c0_2, %c0_3], %4 {strides = array<i32>} : memref<2x1024xf32, #tpu.memory_space<vmem>>, vector<2x1024xf32>,
    return
  }
  func.func @transform_0(%arg0: i32) -> (i32, i32) {
    %c0_i32 = arith.constant 0 : i32
    %c0_i32_0 = arith.constant 0 : i32
    return %arg0, %c0_i32 : i32, i32
  }
  func.func @transform_1(%arg0: i32) -> (i32, i32) {
    %c0_i32 = arith.constant 0 : i32
    %c0_i32_0 = arith.constant 0 : i32
    return %arg0, %c0_i32 : i32, i32
  }
}

</mosaic_0001>

<bundles_post_ra>
// kernel: tpu_custom_call.1
= control target key start
LH: loop header
LB: loop body
LE: loop exit
PB: predicated region body
PF: predicated region fallthrough
CT: control target
= control target key end

     0   :  { %6 = vsyncpa [#allocation3], 0  ;;  %s130_s0 = inlined_call_operand.hbm [shape: f32[2,1024], index: 0, kind: input, shape index: {}]   ;;  %s131_s1 = inlined_call_operand.hbm [shape: f32[2,1024], index: 1, kind: output, shape index: {}]  }
   0x1   :  { %7 = vsyncpa [#allocation4], 0  ;;  %s94_s6 = smov [#allocation2]   ;;  %s46_s10 = scalar_lea.hbm %s130_s0, 256 }
   0x2   :  { %s14_s7 = sshll.u32 %s94_s6, 4  ;;  %p47_p0 = scmp.ne.s32.totalorder %s130_s0, %s46_s10  ;;  %s15_s7 = int_to_ptr.vmem [resolvable:$true] %s14_s7 }
   0x3   :  { %p50_p1 = scmp.lt.u32.totalorder %s46_s10, %s130_s0 }
   0x5   :  { %p52_p2 = pnand %p50_p1, %p47_p0 }
   0x7   :  { %55 = shalt.err (!%p52_p2)
}
   0x8   :  { %s56_s15 = scalar_lea.vmem %s15_s7, 256  ;;  %p61_p4 = scmp.lt.s32.totalorder %s15_s7, %s15_s7 }
   0x9   :  { %p57_p3 = scmp.ne.s32.totalorder %s15_s7, %s56_s15  ;;  %p62_p5 = scmp.lt.s32.totalorder %s56_s15, %s56_s15 }
   0xb   :  { %p63_p6 = por %p62_p5, %p61_p4 }
   0xd   :  { %p64_p7 = pnand %p63_p6, %p57_p3 }
   0xf   :  { %67 = shalt.err (!%p64_p7)
}
  0x10   :  { %17 = dma.hbm_to_vmem [thread:$0]  %s130_s0, 256, %s15_s7, [#allocation3]  }
  0x11   :  { %90 = dma.done.wait [#allocation3], 256  }
  0x12   :  { %91 = vsyncadd [#allocation3], 4294967040  ;;  %s95_s18 = smov [#allocation5]   ;;  %v21_v0 = vld [vmem:[#allocation2] sm:$0xff]  ;;  %v22_v1 = vld [vmem:[#allocation2 + $0x8] sm:$0xff] }
  0x13   :  { %s35_s19 = sshll.u32 %s95_s18, 4  ;;  %vm23_vm0 = vcmp.eq.f32.partialorder %v21_v0, -9999.0  ;;  %vm24_vm1 = vcmp.eq.f32.partialorder %v22_v1, -9999.0  ;;  %s36_s19 = int_to_ptr.vmem [resolvable:$true] %s35_s19 }
  0x14   :  { %v25_v2 = vsel %vm23_vm0, 0.0, %v21_v0  ;;  %v26_v3 = vsel %vm24_vm1, 0.0, %v22_v1  ;;  %s68_s20 = scalar_lea.vmem %s36_s19, 256  ;;  %p73_p9 = scmp.lt.s32.totalorder %s36_s19, %s36_s19 }
  0x15   :  { %27 = vst [vmem:[#allocation5] sm:$0xff] %v25_v2  ;;  %28 = vst [vmem:[#allocation5 + $0x8] sm:$0xff] %v26_v3  ;;  %p69_p8 = scmp.ne.s32.totalorder %s36_s19, %s68_s20  ;;  %p74_p10 = scmp.lt.s32.totalorder %s68_s20, %s68_s20 }
  0x17   :  { %p75_p11 = por %p74_p10, %p73_p9 }
  0x19   :  { %p76_p12 = pnand %p75_p11, %p69_p8 }
  0x1b   :  { %79 = shalt.err (!%p76_p12)
}
  0x1c   :  { %s80_s22 = scalar_lea.hbm %s131_s1, 256 }
  0x1d   :  { %p81_p13 = scmp.ne.s32.totalorder %s131_s1, %s80_s22  ;;  %p84_p0 = scmp.lt.u32.totalorder %s80_s22, %s131_s1 }
  0x1f   :  { %p86_p1 = pnand %p84_p0, %p81_p13 }
  0x21   :  { %89 = shalt.err (!%p86_p1)
}
  0x22   :  { %38 = dma.vmem_to_hbm [thread:$0]  %s36_s19, 256, %s131_s1, [#allocation4]  }
  0x23   :  { %92 = dma.done.wait [#allocation4], 256  }
  0x24   :  { %93 = vsyncadd [#allocation4], 4294967040 }
  0x25   :  { %42 = vsyncpa [#allocation3], 1 }
  0x26   :  { %43 = vsyncpa [#allocation4], 1 }

</bundles_post_ra>
